<compile_context>
chip_gen: v5e
topology: v5e:2x2
jax: 0.10.0
libtpu: 0.0.40
codegen_flags: <defaults>
</compile_context>

<pallas_src>
import functools

import jax
import jax.numpy as jnp
from jax import lax
from jax.experimental import pallas as pl
from jax.experimental.pallas import tpu as pltpu

_LANE = 128
_SUBLANE = 16  # bf16 sublane packing; also satisfies f32 (8)


def _round_up(x, m):
    return ((x + m - 1) // m) * m


# ----------------------------------------------------------------------------
# Fused kernel: one grid step applies block `l` to the resident activation,
# which lives in o_ref (f32, VMEM-resident across the block axis).
# ----------------------------------------------------------------------------
def _fused_mlp_kernel(x_ref, w_in_ref, w_out_ref, o_ref, *, hchunk):
    l = pl.program_id(1)

    @pl.when(l == 0)
    def _():
        # Seed the resident activation from the input tile (once per batch tile).
        o_ref[...] = x_ref[...].astype(o_ref.dtype)

    x = o_ref[...].astype(jnp.bfloat16)      # (tb, F) bf16 MXU input
    tb = x.shape[0]
    F = w_in_ref.shape[1]
    n_chunks = F // hchunk
    inv_sqrt2 = jnp.float32(0.7071067811865476)

    if n_chunks == 1:
        # Small hidden dim: single MXU pass, no chunk loop.
        z = jnp.dot(x, w_in_ref[...], preferred_element_type=jnp.float32)
        a = 0.5 * z * (1.0 + lax.erf(z * inv_sqrt2))      # exact GELU, f32
        acc = jnp.dot(a.astype(jnp.bfloat16), w_out_ref[...],
                      preferred_element_type=jnp.float32)
    else:
        # Chunk the hidden dimension to bound the f32 temporaries (z, gelu) to
        # (tb, hchunk) instead of (tb, F); accumulate the second matmul in f32.
        def body(c, acc):
            k0 = pl.multiple_of(c * hchunk, hchunk)
            z = jnp.dot(x, w_in_ref[:, pl.ds(k0, hchunk)],
                        preferred_element_type=jnp.float32)   # (tb, hchunk)
            a = 0.5 * z * (1.0 + lax.erf(z * inv_sqrt2))
            return acc + jnp.dot(a.astype(jnp.bfloat16),
                                 w_out_ref[pl.ds(k0, hchunk), :],
                                 preferred_element_type=jnp.float32)

        acc = lax.fori_loop(0, n_chunks, body,
                            jnp.zeros((tb, F), jnp.float32), unroll=2)

    # Running activation stays resident in o_ref; HBM writeback happens only
    # when the batch-tile index changes (canonical P3 accumulator pattern).
    o_ref[...] = acc


# ----------------------------------------------------------------------------
# Parameter construction (PyTorch layout) and one-time prepare step
# ----------------------------------------------------------------------------
def init_mlp_model_params(key, in_features, out_features, hidden_features,
                          hidden_blocks):
    """Deterministic init matching the PyTorch module (randn * sqrt(2/fan_in)).

    All mesh axis sizes == 1, so weight shapes are unsharded:
      block 0      : MLPBlock(in_features,  hidden, hidden)
      blocks 1..H  : MLPBlock(hidden,       hidden, hidden)
      last block   : MLPBlock(hidden,       out,    hidden)
    """
    specs = ([(in_features, hidden_features, hidden_features)]
             + [(hidden_features, hidden_features, hidden_features)
                for _ in range(hidden_blocks)]
             + [(hidden_features, out_features, hidden_features)])
    params = []
    for (f_in, f_out, f_hid) in specs:
        key, k1, k2 = jax.random.split(key, 3)
        w_in = (jax.random.normal(k1, (f_hid, f_in), jnp.float32)
                * jnp.sqrt(2.0 / f_in))
        w_out = (jax.random.normal(k2, (f_out, f_hid), jnp.float32)
                 * jnp.sqrt(2.0 / f_hid))
        params.append((w_in, w_out))
    return params


def prepare_params(params):
    """One-time glue: transpose, zero-pad every feature dim to a common
    lane-dense F (multiple of 128), cast to bf16 and stack to (L, F, F).

    Zero padding is exact: padded input columns hit zero weight rows,
    gelu(0) == 0, and padded output columns come from zero weight columns,
    so the padded lanes stay zero through the whole chain.
    """
    dims = set()
    for w_in, w_out in params:
        hid, f_in = w_in.shape
        f_out, _ = w_out.shape
        dims.update((f_in, hid, f_out))
    F = _round_up(max(dims), _LANE)

    w_in_stack, w_out_stack = [], []
    for w_in, w_out in params:
        hid, f_in = w_in.shape
        f_out, _ = w_out.shape
        wi = jnp.zeros((F, F), jnp.bfloat16).at[:f_in, :hid].set(
            jnp.transpose(w_in).astype(jnp.bfloat16))
        wo = jnp.zeros((F, F), jnp.bfloat16).at[:hid, :f_out].set(
            jnp.transpose(w_out).astype(jnp.bfloat16))
        w_in_stack.append(wi)
        w_out_stack.append(wo)
    return jnp.stack(w_in_stack), jnp.stack(w_out_stack)


# ----------------------------------------------------------------------------
# Static planning: batch tile, hidden chunk and VMEM limit per generation.
# ----------------------------------------------------------------------------
def _plan(B, F, batch_tile=None):
    kind = ""
    try:
        kind = jax.devices()[0].device_kind.lower()
    except Exception:
        pass
    is_v7 = ("v7" in kind) or ("7x" in kind)

    # Rows needed to hide the per-step 4*F^2-byte weight DMA behind 4*tb*F^2
    # flops: v5e ~240, v6e ~700, v7x ~320.
    if batch_tile is not None:
        target = batch_tile
    elif "v5" in kind:
        target = 256
    elif "v6" in kind:
        target = 1024
    elif is_v7:
        target = 384
    else:
        target = 512

    # Physical VMEM budget (v7x: 64 MiB, else 128 MiB), keep ~10% headroom.
    try:
        vmem_cap = int(pltpu.get_tpu_info().vmem_capacity_bytes)
    except Exception:
        vmem_cap = (64 << 20) if is_v7 else (128 << 20)
    budget = int(vmem_cap * 0.9)

    # Hidden chunk: largest 128-multiple divisor of F that is <= 512.
    hchunk = 128
    for c in (512, 384, 256, 128):
        if F % c == 0:
            hchunk = c
            break

    def working_set(tb):
        return (2 * tb * F * 2        # x tile, bf16, double-buffered
                + 2 * tb * F * 4      # o tile (f32 resident), double-buffered
                + 8 * F * F           # w_in + w_out, bf16, double-buffered
                + tb * F * 4          # f32 accumulator
                + tb * F * 2          # bf16 cast of resident activation
                + tb * hchunk * 8)    # z (f32) + GELU temp (f32) per chunk

    tb = _round_up(min(target, _round_up(B, _SUBLANE)), _SUBLANE)
    while tb > _SUBLANE and working_set(tb) > budget:
        tb = _round_up(tb // 2, _SUBLANE)

    Bp = _round_up(B, tb)
    n_b = Bp // tb

    # v7x has 2 TensorCores: prefer >=2 batch tiles so the "parallel" axis
    # actually shards across both cores.
    if is_v7 and n_b == 1 and tb >= 2 * _SUBLANE:
        tb = _round_up(tb // 2, _SUBLANE)
        Bp = _round_up(B, tb)
        n_b = Bp // tb

    vmem_limit = min(budget,
                     max(32 << 20, int(working_set(tb) * 1.3) + (4 << 20)))
    return tb, Bp, n_b, hchunk, vmem_limit


# ----------------------------------------------------------------------------
# Forward
# ----------------------------------------------------------------------------
@functools.partial(jax.jit, static_argnames=(
    "out_features", "tb", "Bp", "n_b", "hchunk", "vmem_limit"))
def _forward(x, w_in_stack, w_out_stack, *, out_features, tb, Bp, n_b,
             hchunk, vmem_limit):
    B, d_in = x.shape
    L, F, _ = w_in_stack.shape

    # Pad the activation to (Bp, F) (lane-dense) and cast to bf16 once.
    xb = jnp.zeros((Bp, F), jnp.bfloat16).at[:B, :d_in].set(
        x.astype(jnp.bfloat16))

    flops = 2 * Bp * F * F * 2 * L
    transcendentals = Bp * F * L
    bytes_accessed = (xb.size * xb.dtype.itemsize              # x read
                      + Bp * F * 4                             # out write (f32)
                      + n_b * (w_in_stack.size * w_in_stack.dtype.itemsize
                               + w_out_stack.size * w_out_stack.dtype.itemsize))

    out = pl.pallas_call(
        functools.partial(_fused_mlp_kernel, hchunk=hchunk),
        out_shape=jax.ShapeDtypeStruct((Bp, F), jnp.float32),
        grid=(n_b, L),
        in_specs=[
            pl.BlockSpec((tb, F), lambda i, l: (i, 0)),          # activation
            pl.BlockSpec((None, F, F), lambda i, l: (l, 0, 0)),  # w_in[l]
            pl.BlockSpec((None, F, F), lambda i, l: (l, 0, 0)),  # w_out[l]
        ],
        out_specs=pl.BlockSpec((tb, F), lambda i, l: (i, 0)),
        compiler_params=pltpu.CompilerParams(
            dimension_semantics=("parallel", "arbitrary"),
            vmem_limit_bytes=vmem_limit),
        cost_estimate=pl.CostEstimate(
            flops=flops,
            transcendentals=transcendentals,
            bytes_accessed=bytes_accessed),
    )(xb, w_in_stack, w_out_stack)

    # Unpad; already f32 (resident activation is kept in f32).
    return out[:B, :out_features]


def mlp_model_forward(x, w_in_stack, w_out_stack, *, out_features,
                      batch_tile=None):
    B = x.shape[0]
    F = w_in_stack.shape[1]
    tb, Bp, n_b, hchunk, vmem_limit = _plan(B, F, batch_tile)
    return _forward(x, w_in_stack, w_out_stack, out_features=out_features,
                    tb=tb, Bp=Bp, n_b=n_b, hchunk=hchunk,
                    vmem_limit=vmem_limit)


# ----------------------------------------------------------------------------
# Pure-JAX f32 reference for sanity checking
# ----------------------------------------------------------------------------
def _reference_forward(x, params):
    for (w_in, w_out) in params:
        z = x @ w_in.T
        a = 0.5 * z * (1.0 + lax.erf(z / jnp.sqrt(jnp.float32(2.0))))
        x = a @ w_out.T
    return x


if __name__ == "__main__":
    # Small shapes consistent with the module's forward.
    batch = 8
    in_features = 32
    hidden_features = 64
    out_features = 32
    hidden_blocks = 1   # total blocks = hidden_blocks + 2 = 3

    key = jax.random.PRNGKey(0)
    key, kx = jax.random.split(key)
    x = jax.random.normal(kx, (batch, in_features), jnp.float32)

    params = init_mlp_model_params(key, in_features, out_features,
                                   hidden_features, hidden_blocks)
    w_in_stack, w_out_stack = prepare_params(params)

    out = mlp_model_forward(x, w_in_stack, w_out_stack,
                            out_features=out_features)
    out = jax.block_until_ready(out)

    ref = _reference_forward(x, params)
    assert out.shape == (batch, out_features), out.shape
    # bf16 MXU inputs vs an f32 reference (inter-block activations are f32):
    # tolerance covers the bf16 mantissa error of two matmuls per block.
    assert jnp.allclose(out, ref, atol=1e-1, rtol=5e-2), \
        f"mismatch vs reference (max abs err {jnp.max(jnp.abs(out - ref))})"

    print("KERNEL_OK")
</pallas_src>

<mosaic_0001>
module attributes {stable_mosaic.version = 11 : i64} {
  func.func @_fused_mlp_kernel(%arg0: i32, %arg1: i32, %arg2: memref<16x128xbf16, #tpu.memory_space<vmem>>, %arg3: memref<1x128x128xbf16, #tpu.memory_space<vmem>>, %arg4: memref<1x128x128xbf16, #tpu.memory_space<vmem>>, %arg5: memref<16x128xf32, #tpu.memory_space<vmem>>) attributes {dimension_semantics = [#tpu.dimension_semantics<parallel>, #tpu.dimension_semantics<arbitrary>], iteration_bounds = array<i64: 1, 3>, scalar_prefetch = 0 : i64, scratch_operands = 0 : i64, tpu.core_type = #tpu.core_type<tc>, window_params = [{transform_indices = @transform_0, window_bounds = array<i64: 16, 128>}, {transform_indices = @transform_1, window_bounds = array<i64: 1, 128, 128>}, {transform_indices = @transform_2, window_bounds = array<i64: 1, 128, 128>}, {transform_indices = @transform_3, window_bounds = array<i64: 16, 128>}]} {
    %c0_i32 = arith.constant 0 : i32
    %0 = arith.cmpi eq, %arg1, %c0_i32 : i32
    %1 = arith.extui %0 : i1 to i32
    %c0_i32_0 = arith.constant 0 : i32
    %2 = arith.cmpi ne, %1, %c0_i32_0 : i32
    scf.if %2 {
      %c0_14 = arith.constant 0 : index
      %c0_15 = arith.constant 0 : index
      %21 = vector.load %arg2[%c0_14, %c0_15] : memref<16x128xbf16, #tpu.memory_space<vmem>>, vector<16x128xbf16>
      %22 = arith.extf %21 : vector<16x128xbf16> to vector<16x128xf32>
      %c0_16 = arith.constant 0 : index
      %c0_17 = arith.constant 0 : index
      %23 = vector.load %arg5[%c0_16, %c0_17] : memref<16x128xf32, #tpu.memory_space<vmem>>, vector<16x128xf32>
      tpu.vector_store %arg5[%c0_16, %c0_17], %22 {strides = array<i32>} : memref<16x128xf32, #tpu.memory_space<vmem>>, vector<16x128xf32>,
    } else {
    }
    %c0 = arith.constant 0 : index
    %c0_1 = arith.constant 0 : index
    %3 = vector.load %arg5[%c0, %c0_1] : memref<16x128xf32, #tpu.memory_space<vmem>>, vector<16x128xf32>
    %4 = arith.truncf %3 : vector<16x128xf32> to vector<16x128xbf16>
    %c0_2 = arith.constant 0 : index
    %c0_3 = arith.constant 0 : index
    %c0_4 = arith.constant 0 : index
    %5 = vector.load %arg3[%c0_2, %c0_3, %c0_4] : memref<1x128x128xbf16, #tpu.memory_space<vmem>>, vector<1x128x128xbf16>
    %6 = vector.shape_cast %5 : vector<1x128x128xbf16> to vector<128x128xbf16>
    %cst = arith.constant dense<0.000000e+00> : vector<16x128xf32>
    %7 = tpu.matmul %4, %6, %cst {dimension_numbers = #tpu.dot_dimension_numbers<[1], [0], [0], [1], [0, 0, 1, 1], [], []>} : vector<16x128xbf16>, vector<128x128xbf16>, vector<16x128xf32> -> vector<16x128xf32>
    %cst_5 = arith.constant 5.000000e-01 : f32
    %8 = vector.broadcast %cst_5 : f32 to vector<16x128xf32>
    %9 = arith.mulf %8, %7 : vector<16x128xf32>
    %cst_6 = arith.constant 0.707106769 : f32
    %10 = vector.broadcast %cst_6 : f32 to vector<16x128xf32>
    %11 = arith.mulf %7, %10 : vector<16x128xf32>
    %12 = math.erf %11 : vector<16x128xf32>
    %cst_7 = arith.constant 1.000000e+00 : f32
    %13 = vector.broadcast %cst_7 : f32 to vector<16x128xf32>
    %14 = arith.addf %13, %12 : vector<16x128xf32>
    %15 = arith.mulf %9, %14 : vector<16x128xf32>
    %16 = arith.truncf %15 : vector<16x128xf32> to vector<16x128xbf16>
    %c0_8 = arith.constant 0 : index
    %c0_9 = arith.constant 0 : index
    %c0_10 = arith.constant 0 : index
    %17 = vector.load %arg4[%c0_8, %c0_9, %c0_10] : memref<1x128x128xbf16, #tpu.memory_space<vmem>>, vector<1x128x128xbf16>
    %18 = vector.shape_cast %17 : vector<1x128x128xbf16> to vector<128x128xbf16>
    %cst_11 = arith.constant dense<0.000000e+00> : vector<16x128xf32>
    %19 = tpu.matmul %16, %18, %cst_11 {dimension_numbers = #tpu.dot_dimension_numbers<[1], [0], [0], [1], [0, 0, 1, 1], [], []>} : vector<16x128xbf16>, vector<128x128xbf16>, vector<16x128xf32> -> vector<16x128xf32>
    %c0_12 = arith.constant 0 : index
    %c0_13 = arith.constant 0 : index
    %20 = vector.load %arg5[%c0_12, %c0_13] : memref<16x128xf32, #tpu.memory_space<vmem>>, vector<16x128xf32>
    tpu.vector_store %arg5[%c0_12, %c0_13], %19 {strides = array<i32>} : memref<16x128xf32, #tpu.memory_space<vmem>>, vector<16x128xf32>,
    return
  }
  func.func @transform_0(%arg0: i32, %arg1: i32) -> (i32, i32) {
    %c0_i32 = arith.constant 0 : i32
    %c0_i32_0 = arith.constant 0 : i32
    return %arg0, %c0_i32 : i32, i32
  }
  func.func @transform_1(%arg0: i32, %arg1: i32) -> (i32, i32, i32) {
    %c0_i32 = arith.constant 0 : i32
    %c0_i32_0 = arith.constant 0 : i32
    %c0_i32_1 = arith.constant 0 : i32
    return %arg1, %c0_i32, %c0_i32_0 : i32, i32, i32
  }
  func.func @transform_2(%arg0: i32, %arg1: i32) -> (i32, i32, i32) {
    %c0_i32 = arith.constant 0 : i32
    %c0_i32_0 = arith.constant 0 : i32
    %c0_i32_1 = arith.constant 0 : i32
    return %arg1, %c0_i32, %c0_i32_0 : i32, i32, i32
  }
  func.func @transform_3(%arg0: i32, %arg1: i32) -> (i32, i32) {
    %c0_i32 = arith.constant 0 : i32
    %c0_i32_0 = arith.constant 0 : i32
    return %arg0, %c0_i32 : i32, i32
  }
}

</mosaic_0001>

<bundles_post_ra>
// kernel: _forward.1
= control target key start
LH: loop header
LB: loop body
LE: loop exit
PB: predicated region body
PF: predicated region fallthrough
CT: control target
= control target key end

     0   :  { %8 = vsyncpa [#allocation3], 0  ;;  %s1104_s0 = inlined_call_operand.vmem [shape: bf16[16,128], index: 0, kind: input, shape index: {}]   ;;  %s1105_s1 = inlined_call_operand.hbm [shape: bf16[3,128,128], index: 1, kind: input, shape index: {}]   ;;  %s1106_s2 = inlined_call_operand.hbm [shape: bf16[3,128,128], index: 2, kind: input, shape index: {}]   ;;  %s1107_s3 = inlined_call_operand.vmem [shape: f32[16,128], index: 3, kind: output, shape index: {}]  }
   0x1   :  { %10 = vsyncpa [#allocation3 + $0x1], 0 }
   0x2   :  { %11 = vsyncpa [#allocation5], 0 }
   0x3   :  { %13 = vsyncpa [#allocation5 + $0x1], 0  ;;  %s951_s12 = smov 0   ;;  %s953_s13 = smov 0  }
   0x4   :  { %s955_s14 = smov 0   ;;  %s957_s15 = smov 0  }
   0x5   :  { %s959_s16 = smov 0   ;;  %s961_s17 = smov 0  }
   0x6 LB: > { %s641_s18 = sadd.s32 4294967295, %s927_s17   ;;  %s28_s19 = sadd.s32 1, %s923_s16  ;;  %s927_s17 = sphi %s961_s17, %s19_s17   ;;  %s923_s16 = sphi %s959_s16, %s1115_s16   ;;  %s919_s15 = sphi %s957_s15, %s1114_s15   ;;  %s915_s14 = sphi %s955_s14, %s1113_s14   ;;  %s911_s13 = sphi %s953_s13, %s1112_s13   ;;  %s907_s12 = sphi %s951_s12, %s1111_s12  }
   0x7   : > { %p29_p0 = scmp.ge.s32.totalorder %s28_s19, 3  ;;  %s64_s20 = sadd.s32 1, %s915_s14 }
   0x8   : > { %p71_p1 = scmp.ne.s32.totalorder %s915_s14, %s911_s13  ;;  %p72_p2 = scmp.eq.s32.totalorder %s927_s17, 0 }
   0x9   : > { %s1117_s19 = smov (%p29_p0, %s28_s19), 0  ;;  %p77_p4 = scmp.ne.s32.totalorder %s911_s13, %s907_s12 }
   0xa   : > { %p987_p3 = por %p72_p2, %p71_p1  ;;  %s61_s22 = ssub.s32 %s923_s16, %s1117_s19 }
   0xb   : > { %p78_p5 = scmp.eq.s32.totalorder %s641_s18, 0  ;;  %p62_p6 = scmp.eq.s32.totalorder %s61_s22, 0 }
   0xc   : > { %p758_p8 = scmp.lt.s32.totalorder %s927_s17, 3  ;;  %s1003_s25 = sand.u32 1, %s915_s14  }
   0xd   : > { %p994_p7 = por %p78_p5, %p77_p4  ;;  %s725_s26 = sshll.u32 %s923_s16, 6 }
   0xe   : > { %s1000_s24 = scalar_select %p62_p6, %s915_s14, %s64_s20  }
   0xf   : > { %s645_s27 = sshll.u32 %s1003_s25, 6  ;;  %s171_s30 = scalar_lea.hbm %s1105_s1, %s725_s26 }
  0x10   : > { %s172_s4 = sshll.u32 %s171_s30, 4  ;;  %s166_s5 = scalar_lea.vmem [#allocation2], %s645_s27  ;;  %s173_s4 = int_to_ptr.hbm [resolvable:$true] %s172_s4 }
  0x11   : > { %s174_s6 = sshll.u32 %s166_s5, 4  ;;  %p1012_p9 = pnand %p758_p8, %p987_p3  ;;  %s175_s6 = int_to_ptr.vmem [resolvable:$true] %s174_s6 }
  0x12   : > { %p651_p10 = scmp.ge.s32.totalorder %s927_s17, 1  ;;  %p204_p11 = scmp.lt.s32.totalorder %s927_s17, 4 }
  0x13   : > { %s163_s8 = scalar_lea.sflag [#allocation3], %s1003_s25  ;;  %s929_s9 = smov 64  }
  0x14   : > { %s930_s10 = smov 4   ;;  %p205_p12 = pnand %p651_p10, %p204_p11 }
  0x15   : > { %754 = dma.hbm_to_vmem [thread:$0]  (!%p1012_p9), %s173_s4, 1024, %s175_s6, %s163_s8, %s929_s9, %s929_s9, %s930_s10  }
  0x16   : > { %s193_s18 = scalar_lea.hbm %s1106_s2, %s725_s26  ;;  %s188_s21 = scalar_lea.vmem [#allocation4], %s645_s27 }
  0x17   : > { %s194_s20 = sshll.u32 %s193_s18, 4  ;;  %s196_s22 = sshll.u32 %s188_s21, 4  ;;  %s195_s20 = int_to_ptr.hbm [resolvable:$true] %s194_s20  ;;  %s197_s22 = int_to_ptr.vmem [resolvable:$true] %s196_s22 }
  0x18   : > { %s185_s28 = scalar_lea.sflag [#allocation5], %s1003_s25  ;;  %208 = sbr.rel (%p205_p12) target bundleno = 398 (0x18e), region = 32 }
  0x19   : > { %757 = dma.hbm_to_vmem [thread:$0]  (!%p1012_p9), %s195_s20, 1024, %s197_s22, %s185_s28, %s929_s9, %s929_s9, %s930_s10  }
  0x1a   : > { %s210_s29 = sand.u32 (!%p205_p12), 1, %s911_s13  }
  0x1b   : > { %s652_s30 = sshll.u32 (!%p205_p12), %s210_s29, 6  ;;  %s211_s5 = scalar_lea.sflag (!%p205_p12), [#allocation3], %s210_s29 }
  0x1c   : > { %s214_s4 = scalar_lea.vmem (!%p205_p12), [#allocation2], %s652_s30 }
  0x1d   : > { %898 = dma.done.wait (%p994_p7), %s211_s5, 1024  }
  0x1e   : > { %900 = vsyncadd (%p994_p7), %s211_s5, 4294966272  ;;  %s221_s26 = scalar_lea.sflag [#allocation5], %s210_s29  ;;  %s1032_s27 = scalar_lea.vmem [#allocation4], %s652_s30 }
  0x1f   : > { %902 = dma.done.wait (%p994_p7), %s221_s26, 1024  }
  0x20   : > { %904 = vsyncadd (%p994_p7), %s221_s26, 4294966272  ;;  %p654_p13 = scmp.ne.s32.totalorder %s919_s15, 0 }
  0x22   : > { %273 = sbr.rel (%p654_p13) target bundleno = 44 (0x2c), region = 44 }
  0x27   : > { %v744_v0 = vld [vmem:[%s1104_s0] sm:$0xff]  }
  0x28   : > { %v745_v1 = vunpack.c.l.bf16 %v744_v0  ;;  %v746_v2 = vunpack.c.h.bf16 %v744_v0 }
  0x2a   : > { %278 = vst [vmem:[%s1107_s3] sm:$0xff] %v745_v1 }
  0x2b   : > { %279 = vst [vmem:[%s1107_s3 + $0x8] sm:$0xff] %v746_v2 }
  0x2c PF: > { %v734_v3 = vld [vmem:[%s214_s4 + $0x38] sm:$0xff]  ;;  %v733_v4 = vld [vmem:[%s214_s4 + $0x30] sm:$0xff]  ;;  %v732_v5 = vld [vmem:[%s214_s4 + $0x28] sm:$0xff] }
  0x2d   : > { %347 = vmatpush.bf16.msra.mxu0 %v734_v3  ;;  %v731_v6 = vld [vmem:[%s214_s4 + $0x20] sm:$0xff]  ;;  %v730_v7 = vld [vmem:[%s214_s4 + $0x18] sm:$0xff]  ;;  %v729_v8 = vld [vmem:[%s214_s4 + $0x10] sm:$0xff] }
  0x2e   : > { %v728_v9 = vld [vmem:[%s214_s4 + $0x8] sm:$0xff]  ;;  %v727_v10 = vld [vmem:[%s214_s4] sm:$0xff]  ;;  %v742_v14 = vld [vmem:[%s1032_s27 + $0x38] sm:$0xff] }
  0x2f   : > { %514 = vmatpush.bf16.msra.mxu1 %v742_v14  ;;  %v741_v18 = vld [vmem:[%s1032_s27 + $0x30] sm:$0xff]  ;;  %v740_v22 = vld [vmem:[%s1032_s27 + $0x28] sm:$0xff]  ;;  %v739_v28 = vld [vmem:[%s1032_s27 + $0x20] sm:$0xff] }
  0x30   : > { %v738_v34 = vld [vmem:[%s1032_s27 + $0x18] sm:$0xff]  ;;  %v737_v42 = vld [vmem:[%s1032_s27 + $0x10] sm:$0xff]  ;;  %v736_v50 = vld [vmem:[%s1032_s27 + $0x8] sm:$0xff] }
  0x31   : > { %348 = vmatpush.bf16.msra.mxu0 %v733_v4  ;;  %v280_v11 = vld [vmem:[%s1107_s3] sm:$0xff] }
  0x32   : > { %v281_v12 = vld [vmem:[%s1107_s3 + $0x8] sm:$0xff]  ;;  %v735_v56 = vld [vmem:[%s1032_s27] sm:$0xff] }
  0x33   : > { %v282_v13 = vpack.c.bf16 %v281_v12, %v280_v11  ;;  %515 = vmatpush.bf16.msra.mxu1 %v741_v18 }
  0x35   : > { %349 = vmatpush.bf16.msra.mxu0 %v732_v5 }
  0x37   : > { %516 = vmatpush.bf16.msra.mxu1 %v740_v22 }
  0x39   : > { %350 = vmatpush.bf16.msra.mxu0 %v731_v6 }
  0x3b   : > { %517 = vmatpush.bf16.msra.mxu1 %v739_v28 }
  0x3d   : > { %351 = vmatpush.bf16.msra.mxu0 %v730_v7 }
  0x3f   : > { %518 = vmatpush.bf16.msra.mxu1 %v738_v34 }
  0x41   : > { %352 = vmatpush.bf16.msra.mxu0 %v729_v8 }
  0x43   : > { %519 = vmatpush.bf16.msra.mxu1 %v737_v42 }
  0x45   : > { %353 = vmatpush.bf16.msra.mxu0 %v728_v9 }
  0x47   : > { %520 = vmatpush.bf16.msra.mxu1 %v736_v50 }
  0x49   : > { %354 = vmatpush.bf16.msra.mxu0 %v727_v10 }
  0x4b   : > { %521 = vmatpush.bf16.msra.mxu1 %v735_v56 }
  0x4c   : > { %355 = vmatmul.bf16.vlgmr.msra.gmra.mxu0 %v282_v13 }
  0xc9   : > { %v1055_v15 = vpop.f32.mrf.mxu0 }
  0xca   : > { %v1058_v16 = vmul.f32 0.70710677, %v1055_v15 }
  0xcc   : > { %v365_v17 = vmul.f32 %v1058_v16, %v1058_v16 }
  0xce   : > { %v366_v19 = vmin.f32 %v365_v17, 16.0 }
  0xd0   : > { %v367_v20 = vmul.f32 2.1237322e-06, %v366_v19  ;;  %v378_v21 = vmul.f32 3.8918573e-05, %v366_v19 }
  0xd1   : > { %v1064_v23 = vpop.f32.mrf.mxu0 }
  0xd2   : > { %v368_v24 = vadd.f32 0.00028619796, %v367_v20  ;;  %v379_v25 = vadd.f32 0.001143296, %v378_v21  ;;  %v1067_v26 = vmul.f32 0.70710677, %v1064_v23 }
  0xd4   : > { %v380_v27 = vmul.f32 %v379_v25, %v366_v19  ;;  %v405_v29 = vmul.f32 %v1067_v26, %v1067_v26  ;;  %v369_v30 = vmul.f32 %v368_v24, %v366_v19 }
  0xd6   : > { %v381_v31 = vadd.f32 0.014752088, %v380_v27  ;;  %v406_v32 = vmin.f32 %v405_v29, 16.0  ;;  %v370_v37 = vadd.f32 0.0036580483, %v369_v30 }
  0xd8   : > { %v382_v33 = vmul.f32 %v381_v31, %v366_v19  ;;  %v407_v35 = vmul.f32 2.1237322e-06, %v406_v32  ;;  %v418_v36 = vmul.f32 3.8918573e-05, %v406_v32  ;;  %v371_v45 = vmul.f32 %v370_v37, %v366_v19 }
  0xd9   : > { %v362_v37 = vmul.f32 0.5, %v1064_v23 }
  0xda   : > { %v383_v38 = vadd.f32 0.112945676, %v382_v33  ;;  %v408_v39 = vadd.f32 0.00028619796, %v407_v35  ;;  %v419_v40 = vadd.f32 0.001143296, %v418_v36 }
  0xdb   : > { %v372_v52 = vadd.f32 0.05243302, %v371_v45  ;;  %v361_v36 = vmul.f32 0.5, %v1055_v15 }
  0xdc   : > { %v384_v41 = vmul.f32 %v383_v38, %v366_v19  ;;  %v409_v43 = vmul.f32 %v408_v39, %v406_v32  ;;  %v420_v44 = vmul.f32 %v419_v40, %v406_v32 }
  0xdd   : > { %v373_v58 = vmul.f32 %v372_v52, %v366_v19 }
  0xde   : > { %v385_v46 = vadd.f32 0.4994258, %v384_v41  ;;  %v410_v47 = vadd.f32 0.0036580483, %v409_v43  ;;  %v421_v48 = vadd.f32 0.014752088, %v420_v44 }
  0xdf   : > { %v374_v63 = vadd.f32 0.18741608, %v373_v58 }
  0xe0   : > { %v386_v49 = vmul.f32 %v385_v46, %v366_v19  ;;  %v422_v51 = vmul.f32 %v421_v48, %v406_v32  ;;  %v411_v54 = vmul.f32 %v410_v47, %v406_v32 }
  0xe1   : > { %v375_v4 = vmul.f32 %v374_v63, %v366_v19 }
  0xe2   : > { %v387_v53 = vadd.f32 1.0, %v386_v49  ;;  %v423_v55 = vadd.f32 0.112945676, %v422_v51  ;;  %v412_v59 = vadd.f32 0.05243302, %v411_v54 }
  0xe3   : > { %v376_v10 = vadd.f32 1.1283791, %v375_v4 }
  0xe4   : > { %809 = vrcp.f32 %v387_v53  ;;  %v424_v57 = vmul.f32 %v423_v55, %v406_v32  ;;  %v413_v1 = vmul.f32 %v412_v59, %v406_v32  ;;  %v399_v6 = vand.u32 2147483648, %v387_v53 }
  0xe5   : > { %v397_v8 = vand.u32 2147483647, %v387_v53  ;;  %vm393_vm1 = vweird.f32 %v387_v53  ;;  %v377_v20 = vmul.f32 %v376_v10, %v1058_v16 }
  0xe6   : > { %v425_v60 = vadd.f32 0.4994258, %v424_v57  ;;  %v414_v7 = vadd.f32 0.18741608, %v413_v1  ;;  %v400_v13 = vor.u32 1.1754944e-38, %v399_v6 }
  0xe7   : > { %vm398_vm3 = vcmp.eq.f32.partialorder %v397_v8, 8.507059e+37 }
  0xe8   : > { %v426_v61 = vmul.f32 %v425_v60, %v406_v32  ;;  %v415_v14 = vmul.f32 %v414_v7, %v406_v32 }
  0xea   : > { %v810_v62 = vpop.eup %809  ;;  %v427_v2 = vadd.f32 1.0, %v426_v61  ;;  %v416_v19 = vadd.f32 1.1283791, %v415_v14 }
  0xeb   : > { %v389_v0 = vmul.f32 %v810_v62, %v387_v53  ;;  %vm394_vm0 = vweird.f32 %v810_v62 }
  0xec   : > { %811 = vrcp.f32 %v427_v2  ;;  %vm395_vm2 = vmor %vm393_vm1, %vm394_vm0  ;;  %v439_v22 = vand.u32 2147483648, %v427_v2  ;;  %v437_v27 = vand.u32 2147483647, %v427_v2  ;;  %vm433_vm5 = vweird.f32 %v427_v2 }
  0xed   : > { %v390_v3 = vsub.f32 1.0, %v389_v0  ;;  %v417_v30 = vmul.f32 %v416_v19, %v1067_v26 }
  0xee   : > { %v440_v29 = vor.u32 1.1754944e-38, %v439_v22  ;;  %vm438_vm7 = vcmp.eq.f32.partialorder %v437_v27, 8.507059e+37 }
  0xef   : > { %v391_v5 = vmul.f32 %v810_v62, %v390_v3 }
  0xf1   : > { %v392_v9 = vadd.f32 %v810_v62, %v391_v5 }
  0xf2   : > { %v812_v11 = vpop.eup %811 }
  0xf3   : > { %v396_v12 = vsel %vm395_vm2, %v810_v62, %v392_v9  ;;  %v429_v17 = vmul.f32 %v812_v11, %v427_v2  ;;  %vm434_vm4 = vweird.f32 %v812_v11 }
  0xf4   : > { %v401_v18 = vsel %vm398_vm3, %v400_v13, %v396_v12  ;;  %vm435_vm6 = vmor %vm433_vm5, %vm434_vm4 }
  0xf5   : > { %v430_v21 = vsub.f32 1.0, %v429_v17  ;;  %v402_v24 = vmul.f32 %v401_v18, %v377_v20 }
  0xf7   : > { %v431_v25 = vmul.f32 %v812_v11, %v430_v21  ;;  %v687_v32 = vclamps-f32 %v402_v24, 1.0 }
  0xf9   : > { %v432_v28 = vadd.f32 %v812_v11, %v431_v25  ;;  %v445_v16 = vadd.f32 1.0, %v687_v32 }
  0xfb   : > { %v436_v31 = vsel %vm435_vm6, %v812_v11, %v432_v28  ;;  %v447_v40 = vmul.f32 %v445_v16, %v361_v36 }
  0xfc   : > { %v441_v33 = vsel %vm438_vm7, %v440_v29, %v436_v31 }
  0xfd   : > { %v442_v34 = vmul.f32 %v441_v33, %v417_v30 }
  0xff   : > { %v688_v35 = vclamps-f32 %v442_v34, 1.0 }
 0x101   : > { %v446_v38 = vadd.f32 1.0, %v688_v35 }
 0x103   : > { %v448_v39 = vmul.f32 %v446_v38, %v362_v37 }
 0x105   : > { %v449_v41 = vpack.c.bf16 %v448_v39, %v447_v40 }
 0x107   : > { %522 = vmatmul.bf16.vlgmr.msra.gmra.mxu1 %v449_v41 }
 0x184   : > { %v523_v42 = vpop.f32.mrf.mxu1 }
 0x185   : > { %528 = vst [vmem:[%s1107_s3] sm:$0xff] %v523_v42 }
 0x18c   : > { %v525_v26 = vpop.f32.mrf.mxu1 }
 0x18d   : > { %529 = vst [vmem:[%s1107_s3 + $0x8] sm:$0xff] %v525_v26 }
 0x18e PF: > { %s19_s17 = sadd.s32 1, %s927_s17   ;;  %s1111_s12 = smov %s911_s13 }
 0x18f   : > { %p16_p0 = scmp.ge.s32.totalorder %s19_s17, 5   ;;  %s1112_s13 = smov %s915_s14 }
 0x190   : > { %s1113_s14 = smov %s1000_s24  ;;  %s1114_s15 = smov %s923_s16 }
 0x191   : > { %s1115_s16 = smov %s1117_s19  ;;  %18 = sbr.rel (!%p16_p0) target bundleno = 6 (0x6), region = 92 }
 0x196   :  { %552 = vsyncpa [#allocation3], 1 }
 0x197   :  { %554 = vsyncpa [#allocation3 + $0x1], 1 }
 0x198   :  { %555 = vsyncpa [#allocation5], 1 }
 0x199   :  { %557 = vsyncpa [#allocation5 + $0x1], 1 }

</bundles_post_ra>
